<compile_context>
chip_gen: v7x
topology: tpu7x:2x2x1
jax: 0.10.0
libtpu: 0.0.40
codegen_flags: <defaults>
</compile_context>

<pallas_src>
import functools
import numpy as np
import jax
import jax.numpy as jnp
from jax.experimental import pallas as pl
from jax.experimental.pallas import tpu as pltpu

_LANE = 128


def _round_up(x, m):
    return (x + m - 1) // m * m


def _sage_fused_kernel(
    centers_ref,            # SMEM [G] int32 (scalar prefetch)
    x0_ref,                 # VMEM [N, Hp]  f32  padded initial node features
    a_ref,                  # VMEM [N, N]   bf16 row-normalized adjacency
    wlr_ref,                # VMEM [L, Hp, 2*Hp] f32  fused [W_l | W_r], padded
    bl_ref,                 # VMEM [L, 1, Hp]    f32
    w1_ref,                 # VMEM [Hp, Hp] f32
    b1_ref,                 # VMEM [1, Hp]  f32
    w2_ref,                 # VMEM [Hp, 1]  f32
    b2_ref,                 # VMEM [1, 1]   f32
    out_ref,                # VMEM [G, 1]   f32
    x_res,                  # VMEM scratch [N, Hp] f32
    src_res,                # VMEM scratch [G, Hp] f32
    dst_res,                # VMEM scratch [G, Hp] f32
    *, num_layers, hp, num_graphs):
    a = a_ref[...]          # bf16 adjacency, loaded once
    x = x0_ref[...]         # [N, Hp] f32

    # ---- SAGEConv stack, fully unrolled; x stays resident across layers ----
    for l in range(num_layers):
        # one lane-dense matmul computes both projections: [x@W_l | x@W_r]
        proj = jnp.dot(x, wlr_ref[l], preferred_element_type=jnp.float32)
        proj_l = proj[:, :hp]          # split at a 128-lane boundary (free)
        proj_r = proj[:, hp:]
        # mean aggregation, reassociated: A @ (x @ W_l); bf16 MXU, f32 acc
        agg = jnp.dot(a, proj_l.astype(jnp.bfloat16),
                      preferred_element_type=jnp.float32)
        x = agg + bl_ref[l] + proj_r
        if l < num_layers - 1:
            x = jnp.maximum(x, 0.0)    # relu; dropout is identity at eval
            # TODO(synk): training-mode dropout would need pltpu.prng_* here.

    # ---- center-pair readout straight from the VMEM-resident node states ----
    x_res[...] = x
    for g in range(num_graphs):
        c = centers_ref[g]
        src_res[pl.ds(g, 1), :] = x_res[pl.ds(c, 1), :]
        dst_res[pl.ds(g, 1), :] = x_res[pl.ds(c + 1, 1), :]

    # ---- head: lin2(relu(lin1(x_src * x_dst))) ----
    h = src_res[...] * dst_res[...]
    h = jnp.dot(h, w1_ref[...], preferred_element_type=jnp.float32) + b1_ref[...]
    h = jnp.maximum(h, 0.0)
    out = jnp.dot(h, w2_ref[...], preferred_element_type=jnp.float32) + b2_ref[...]
    out_ref[...] = out.astype(out_ref.dtype)


def sage_forward(z, a_norm, centers, emb_table, conv_params, w1, b1, w2, b2):
    n = a_norm.shape[0]
    hidden = emb_table.shape[1]
    hp = _round_up(max(hidden, _LANE), _LANE)     # lane-dense padded width
    num_layers = len(conv_params)
    num_graphs = centers.shape[0]

    # initial node features: embedding lookup (XLA glue) + zero pad to Hp lanes
    x0 = jnp.zeros((n, hp), jnp.float32).at[:, :hidden].set(
        emb_table[z].astype(jnp.float32))

    # stack + zero-pad conv weights: [L, Hp, 2Hp] fused [W_l | W_r], [L, 1, Hp] bias
    wlr_list, bl_list = [], []
    for (w_l, b_l, w_r) in conv_params:
        wlr_p = jnp.zeros((hp, 2 * hp), jnp.float32)
        wlr_p = wlr_p.at[:hidden, :hidden].set(w_l.astype(jnp.float32))
        wlr_p = wlr_p.at[:hidden, hp:hp + hidden].set(w_r.astype(jnp.float32))
        wlr_list.append(wlr_p)
        bl_list.append(jnp.zeros((1, hp), jnp.float32).at[0, :hidden].set(
            b_l.astype(jnp.float32)))
    wlr = jnp.stack(wlr_list)                     # [L, Hp, 2Hp]
    bl = jnp.stack(bl_list)                       # [L, 1, Hp]

    w1p = jnp.zeros((hp, hp), jnp.float32).at[:hidden, :hidden].set(w1)
    b1p = jnp.zeros((1, hp), jnp.float32).at[0, :hidden].set(b1)
    w2p = jnp.zeros((hp, 1), jnp.float32).at[:hidden, :].set(w2)
    b2p = b2.reshape(1, 1).astype(jnp.float32)

    a_bf16 = a_norm.astype(jnp.bfloat16)          # halves A traffic; f32 acc in-kernel
    centers = centers.astype(jnp.int32)

    kern = functools.partial(_sage_fused_kernel, num_layers=num_layers,
                             hp=hp, num_graphs=num_graphs)
    vmem = pl.BlockSpec(memory_space=pltpu.MemorySpace.VMEM)
    return pl.pallas_call(
        kern,
        out_shape=jax.ShapeDtypeStruct((num_graphs, 1), jnp.float32),
        grid_spec=pltpu.PrefetchScalarGridSpec(
            num_scalar_prefetch=1,
            grid=(),
            in_specs=[vmem] * 8,
            out_specs=vmem,
            scratch_shapes=[
                pltpu.VMEM((n, hp), jnp.float32),           # resident node states
                pltpu.VMEM((num_graphs, hp), jnp.float32),  # gathered x_src
                pltpu.VMEM((num_graphs, hp), jnp.float32),  # gathered x_dst
            ],
        ),
    )(centers, x0, a_bf16, wlr, bl, w1p, b1p, w2p, b2p)


if __name__ == "__main__":
    hidden = 32
    num_layers = 3
    max_z = 10
    num_graphs = 2
    nodes_per_graph = 8
    N = num_graphs * nodes_per_graph

    key = jax.random.PRNGKey(0)
    keys = jax.random.split(key, 4 + 3 * num_layers)

    # ---- inputs ----
    z = jax.random.randint(keys[0], (N,), 0, max_z)            # node labels
    batch = np.repeat(np.arange(num_graphs), nodes_per_graph)  # graph ids

    # random intra-graph edges, deterministic
    rng = np.random.default_rng(0)
    edges = []
    for g in range(num_graphs):
        base = g * nodes_per_graph
        for _ in range(24):
            s = int(rng.integers(0, nodes_per_graph)) + base
            d = int(rng.integers(0, nodes_per_graph)) + base
            edges.append((s, d))
    edge_index = np.asarray(edges, dtype=np.int64).T           # [2, E]

    # dense mean-aggregation matrix matching PyG scatter-mean over edges
    A = np.zeros((N, N), dtype=np.float32)
    np.add.at(A, (edge_index[1], edge_index[0]), 1.0)
    deg = A.sum(axis=1, keepdims=True)
    a_norm = jnp.asarray(np.where(deg > 0, A / np.maximum(deg, 1.0), 0.0),
                         dtype=jnp.float32)

    # center indices: first node of each graph (np.unique return_index)
    _, center_indices = np.unique(batch, return_index=True)
    centers = jnp.asarray(center_indices, dtype=jnp.int32)

    # ---- deterministic parameters (weights stored [in, out]: y = x @ W + b) ----
    emb_table = jax.random.normal(keys[1], (max_z, hidden), jnp.float32)

    conv_params = []
    for l in range(num_layers):
        kk = jax.random.split(keys[2 + l], 3)
        scale = 1.0 / np.sqrt(hidden)
        w_l = jax.random.normal(kk[0], (hidden, hidden), jnp.float32) * scale
        b_l = jax.random.normal(kk[1], (hidden,), jnp.float32) * 0.01
        w_r = jax.random.normal(kk[2], (hidden, hidden), jnp.float32) * scale
        conv_params.append((w_l, b_l, w_r))

    kh = jax.random.split(keys[2 + num_layers], 4)
    w1 = jax.random.normal(kh[0], (hidden, hidden), jnp.float32) / np.sqrt(hidden)
    b1 = jax.random.normal(kh[1], (hidden,), jnp.float32) * 0.01
    w2 = jax.random.normal(kh[2], (hidden, 1), jnp.float32) / np.sqrt(hidden)
    b2 = jax.random.normal(kh[3], (1,), jnp.float32) * 0.01

    out = sage_forward(z, a_norm, centers, emb_table, conv_params, w1, b1, w2, b2)
    jax.block_until_ready(out)
    assert out.shape == (num_graphs, 1)
    print("KERNEL_OK")
</pallas_src>

<mosaic_0001>
module attributes {stable_mosaic.version = 11 : i64} {
  func.func @_sage_fused_kernel(%arg0: memref<2xi32, #tpu.memory_space<smem>>, %arg1: memref<16x128xf32, #tpu.memory_space<vmem>>, %arg2: memref<16x16xbf16, #tpu.memory_space<vmem>>, %arg3: memref<3x128x256xf32, #tpu.memory_space<vmem>>, %arg4: memref<3x1x128xf32, #tpu.memory_space<vmem>>, %arg5: memref<128x128xf32, #tpu.memory_space<vmem>>, %arg6: memref<1x128xf32, #tpu.memory_space<vmem>>, %arg7: memref<128x1xf32, #tpu.memory_space<vmem>>, %arg8: memref<1x1xf32, #tpu.memory_space<vmem>>, %arg9: memref<2x1xf32, #tpu.memory_space<vmem>>, %arg10: memref<16x128xf32, #tpu.memory_space<vmem>>, %arg11: memref<2x128xf32, #tpu.memory_space<vmem>>, %arg12: memref<2x128xf32, #tpu.memory_space<vmem>>) attributes {dimension_semantics = [], scalar_prefetch = 1 : i64, scratch_operands = 3 : i64, tpu.core_type = #tpu.core_type<tc>} {
    %c0 = arith.constant 0 : index
    %c0_0 = arith.constant 0 : index
    %0 = vector.load %arg2[%c0, %c0_0] : memref<16x16xbf16, #tpu.memory_space<vmem>>, vector<16x16xbf16>
    %c0_1 = arith.constant 0 : index
    %c0_2 = arith.constant 0 : index
    %1 = vector.load %arg1[%c0_1, %c0_2] : memref<16x128xf32, #tpu.memory_space<vmem>>, vector<16x128xf32>
    %c0_3 = arith.constant 0 : index
    %c0_4 = arith.constant 0 : index
    %c0_5 = arith.constant 0 : index
    %2 = vector.load %arg3[%c0_3, %c0_4, %c0_5] : memref<3x128x256xf32, #tpu.memory_space<vmem>>, vector<1x128x256xf32>
    %3 = vector.shape_cast %2 : vector<1x128x256xf32> to vector<128x256xf32>
    %cst = arith.constant dense<0.000000e+00> : vector<16x256xf32>
    %4 = tpu.matmul %1, %3, %cst {dimension_numbers = #tpu.dot_dimension_numbers<[1], [0], [0], [1], [0, 0, 1, 1], [], []>} : vector<16x128xf32>, vector<128x256xf32>, vector<16x256xf32> -> vector<16x256xf32>
    %5 = vector.extract_strided_slice %4 {offsets = [0, 0], sizes = [16, 128], strides = [1, 1]} : vector<16x256xf32> to vector<16x128xf32>
    %6 = vector.extract_strided_slice %4 {offsets = [0, 128], sizes = [16, 128], strides = [1, 1]} : vector<16x256xf32> to vector<16x128xf32>
    %7 = arith.truncf %5 : vector<16x128xf32> to vector<16x128xbf16>
    %cst_6 = arith.constant dense<0.000000e+00> : vector<16x128xf32>
    %8 = tpu.matmul %0, %7, %cst_6 {dimension_numbers = #tpu.dot_dimension_numbers<[1], [0], [0], [1], [0, 0, 1, 1], [], []>} : vector<16x16xbf16>, vector<16x128xbf16>, vector<16x128xf32> -> vector<16x128xf32>
    %c0_7 = arith.constant 0 : index
    %c0_8 = arith.constant 0 : index
    %c0_9 = arith.constant 0 : index
    %9 = vector.load %arg4[%c0_7, %c0_8, %c0_9] : memref<3x1x128xf32, #tpu.memory_space<vmem>>, vector<1x1x128xf32>
    %10 = vector.shape_cast %9 : vector<1x1x128xf32> to vector<1x128xf32>
    %11 = vector.broadcast %10 : vector<1x128xf32> to vector<16x128xf32>
    %12 = arith.addf %8, %11 : vector<16x128xf32>
    %13 = arith.addf %12, %6 : vector<16x128xf32>
    %cst_10 = arith.constant 0.000000e+00 : f32
    %14 = vector.broadcast %cst_10 : f32 to vector<16x128xf32>
    %15 = arith.maximumf %13, %14 : vector<16x128xf32>
    %c1 = arith.constant 1 : index
    %c0_11 = arith.constant 0 : index
    %c0_12 = arith.constant 0 : index
    %16 = vector.load %arg3[%c1, %c0_11, %c0_12] : memref<3x128x256xf32, #tpu.memory_space<vmem>>, vector<1x128x256xf32>
    %17 = vector.shape_cast %16 : vector<1x128x256xf32> to vector<128x256xf32>
    %cst_13 = arith.constant dense<0.000000e+00> : vector<16x256xf32>
    %18 = tpu.matmul %15, %17, %cst_13 {dimension_numbers = #tpu.dot_dimension_numbers<[1], [0], [0], [1], [0, 0, 1, 1], [], []>} : vector<16x128xf32>, vector<128x256xf32>, vector<16x256xf32> -> vector<16x256xf32>
    %19 = vector.extract_strided_slice %18 {offsets = [0, 0], sizes = [16, 128], strides = [1, 1]} : vector<16x256xf32> to vector<16x128xf32>
    %20 = vector.extract_strided_slice %18 {offsets = [0, 128], sizes = [16, 128], strides = [1, 1]} : vector<16x256xf32> to vector<16x128xf32>
    %21 = arith.truncf %19 : vector<16x128xf32> to vector<16x128xbf16>
    %cst_14 = arith.constant dense<0.000000e+00> : vector<16x128xf32>
    %22 = tpu.matmul %0, %21, %cst_14 {dimension_numbers = #tpu.dot_dimension_numbers<[1], [0], [0], [1], [0, 0, 1, 1], [], []>} : vector<16x16xbf16>, vector<16x128xbf16>, vector<16x128xf32> -> vector<16x128xf32>
    %c1_15 = arith.constant 1 : index
    %c0_16 = arith.constant 0 : index
    %c0_17 = arith.constant 0 : index
    %23 = vector.load %arg4[%c1_15, %c0_16, %c0_17] : memref<3x1x128xf32, #tpu.memory_space<vmem>>, vector<1x1x128xf32>
    %24 = vector.shape_cast %23 : vector<1x1x128xf32> to vector<1x128xf32>
    %25 = vector.broadcast %24 : vector<1x128xf32> to vector<16x128xf32>
    %26 = arith.addf %22, %25 : vector<16x128xf32>
    %27 = arith.addf %26, %20 : vector<16x128xf32>
    %cst_18 = arith.constant 0.000000e+00 : f32
    %28 = vector.broadcast %cst_18 : f32 to vector<16x128xf32>
    %29 = arith.maximumf %27, %28 : vector<16x128xf32>
    %c2 = arith.constant 2 : index
    %c0_19 = arith.constant 0 : index
    %c0_20 = arith.constant 0 : index
    %30 = vector.load %arg3[%c2, %c0_19, %c0_20] : memref<3x128x256xf32, #tpu.memory_space<vmem>>, vector<1x128x256xf32>
    %31 = vector.shape_cast %30 : vector<1x128x256xf32> to vector<128x256xf32>
    %cst_21 = arith.constant dense<0.000000e+00> : vector<16x256xf32>
    %32 = tpu.matmul %29, %31, %cst_21 {dimension_numbers = #tpu.dot_dimension_numbers<[1], [0], [0], [1], [0, 0, 1, 1], [], []>} : vector<16x128xf32>, vector<128x256xf32>, vector<16x256xf32> -> vector<16x256xf32>
    %33 = vector.extract_strided_slice %32 {offsets = [0, 0], sizes = [16, 128], strides = [1, 1]} : vector<16x256xf32> to vector<16x128xf32>
    %34 = vector.extract_strided_slice %32 {offsets = [0, 128], sizes = [16, 128], strides = [1, 1]} : vector<16x256xf32> to vector<16x128xf32>
    %35 = arith.truncf %33 : vector<16x128xf32> to vector<16x128xbf16>
    %cst_22 = arith.constant dense<0.000000e+00> : vector<16x128xf32>
    %36 = tpu.matmul %0, %35, %cst_22 {dimension_numbers = #tpu.dot_dimension_numbers<[1], [0], [0], [1], [0, 0, 1, 1], [], []>} : vector<16x16xbf16>, vector<16x128xbf16>, vector<16x128xf32> -> vector<16x128xf32>
    %c2_23 = arith.constant 2 : index
    %c0_24 = arith.constant 0 : index
    %c0_25 = arith.constant 0 : index
    %37 = vector.load %arg4[%c2_23, %c0_24, %c0_25] : memref<3x1x128xf32, #tpu.memory_space<vmem>>, vector<1x1x128xf32>
    %38 = vector.shape_cast %37 : vector<1x1x128xf32> to vector<1x128xf32>
    %39 = vector.broadcast %38 : vector<1x128xf32> to vector<16x128xf32>
    %40 = arith.addf %36, %39 : vector<16x128xf32>
    %41 = arith.addf %40, %34 : vector<16x128xf32>
    %c0_26 = arith.constant 0 : index
    %c0_27 = arith.constant 0 : index
    %42 = vector.load %arg10[%c0_26, %c0_27] : memref<16x128xf32, #tpu.memory_space<vmem>>, vector<16x128xf32>
    tpu.vector_store %arg10[%c0_26, %c0_27], %41 {strides = array<i32>} : memref<16x128xf32, #tpu.memory_space<vmem>>, vector<16x128xf32>,
    %c0_28 = arith.constant 0 : index
    %43 = memref.load %arg0[%c0_28] : memref<2xi32, #tpu.memory_space<smem>>
    %44 = arith.index_cast %43 : i32 to index
    %c0_29 = arith.constant 0 : index
    %45 = vector.load %arg10[%44, %c0_29] : memref<16x128xf32, #tpu.memory_space<vmem>>, vector<1x128xf32>
    %c0_30 = arith.constant 0 : index
    %c0_31 = arith.constant 0 : index
    %46 = vector.load %arg11[%c0_30, %c0_31] : memref<2x128xf32, #tpu.memory_space<vmem>>, vector<1x128xf32>
    tpu.vector_store %arg11[%c0_30, %c0_31], %45 {strides = array<i32>} : memref<2x128xf32, #tpu.memory_space<vmem>>, vector<1x128xf32>,
    %c1_i32 = arith.constant 1 : i32
    %47 = arith.addi %43, %c1_i32 : i32
    %48 = arith.index_cast %47 : i32 to index
    %c0_32 = arith.constant 0 : index
    %49 = vector.load %arg10[%48, %c0_32] : memref<16x128xf32, #tpu.memory_space<vmem>>, vector<1x128xf32>
    %c0_33 = arith.constant 0 : index
    %c0_34 = arith.constant 0 : index
    %50 = vector.load %arg12[%c0_33, %c0_34] : memref<2x128xf32, #tpu.memory_space<vmem>>, vector<1x128xf32>
    tpu.vector_store %arg12[%c0_33, %c0_34], %49 {strides = array<i32>} : memref<2x128xf32, #tpu.memory_space<vmem>>, vector<1x128xf32>,
    %c1_35 = arith.constant 1 : index
    %51 = memref.load %arg0[%c1_35] : memref<2xi32, #tpu.memory_space<smem>>
    %52 = arith.index_cast %51 : i32 to index
    %c0_36 = arith.constant 0 : index
    %53 = vector.load %arg10[%52, %c0_36] : memref<16x128xf32, #tpu.memory_space<vmem>>, vector<1x128xf32>
    %c1_37 = arith.constant 1 : index
    %c0_38 = arith.constant 0 : index
    %54 = vector.load %arg11[%c1_37, %c0_38] : memref<2x128xf32, #tpu.memory_space<vmem>>, vector<1x128xf32>
    tpu.vector_store %arg11[%c1_37, %c0_38], %53 {strides = array<i32>} : memref<2x128xf32, #tpu.memory_space<vmem>>, vector<1x128xf32>,
    %c1_i32_39 = arith.constant 1 : i32
    %55 = arith.addi %51, %c1_i32_39 : i32
    %56 = arith.index_cast %55 : i32 to index
    %c0_40 = arith.constant 0 : index
    %57 = vector.load %arg10[%56, %c0_40] : memref<16x128xf32, #tpu.memory_space<vmem>>, vector<1x128xf32>
    %c1_41 = arith.constant 1 : index
    %c0_42 = arith.constant 0 : index
    %58 = vector.load %arg12[%c1_41, %c0_42] : memref<2x128xf32, #tpu.memory_space<vmem>>, vector<1x128xf32>
    tpu.vector_store %arg12[%c1_41, %c0_42], %57 {strides = array<i32>} : memref<2x128xf32, #tpu.memory_space<vmem>>, vector<1x128xf32>,
    %c0_43 = arith.constant 0 : index
    %c0_44 = arith.constant 0 : index
    %59 = vector.load %arg11[%c0_43, %c0_44] : memref<2x128xf32, #tpu.memory_space<vmem>>, vector<2x128xf32>
    %c0_45 = arith.constant 0 : index
    %c0_46 = arith.constant 0 : index
    %60 = vector.load %arg12[%c0_45, %c0_46] : memref<2x128xf32, #tpu.memory_space<vmem>>, vector<2x128xf32>
    %61 = arith.mulf %59, %60 : vector<2x128xf32>
    %c0_47 = arith.constant 0 : index
    %c0_48 = arith.constant 0 : index
    %62 = vector.load %arg5[%c0_47, %c0_48] : memref<128x128xf32, #tpu.memory_space<vmem>>, vector<128x128xf32>
    %cst_49 = arith.constant dense<0.000000e+00> : vector<2x128xf32>
    %63 = tpu.matmul %61, %62, %cst_49 {dimension_numbers = #tpu.dot_dimension_numbers<[1], [0], [0], [1], [0, 0, 1, 1], [], []>} : vector<2x128xf32>, vector<128x128xf32>, vector<2x128xf32> -> vector<2x128xf32>
    %c0_50 = arith.constant 0 : index
    %c0_51 = arith.constant 0 : index
    %64 = vector.load %arg6[%c0_50, %c0_51] : memref<1x128xf32, #tpu.memory_space<vmem>>, vector<1x128xf32>
    %65 = vector.broadcast %64 : vector<1x128xf32> to vector<2x128xf32>
    %66 = arith.addf %63, %65 : vector<2x128xf32>
    %cst_52 = arith.constant 0.000000e+00 : f32
    %67 = vector.broadcast %cst_52 : f32 to vector<2x128xf32>
    %68 = arith.maximumf %66, %67 : vector<2x128xf32>
    %c0_53 = arith.constant 0 : index
    %c0_54 = arith.constant 0 : index
    %69 = vector.load %arg7[%c0_53, %c0_54] : memref<128x1xf32, #tpu.memory_space<vmem>>, vector<128x1xf32>
    %cst_55 = arith.constant dense<0.000000e+00> : vector<2x1xf32>
    %70 = tpu.matmul %68, %69, %cst_55 {dimension_numbers = #tpu.dot_dimension_numbers<[1], [0], [0], [1], [0, 0, 1, 1], [], []>} : vector<2x128xf32>, vector<128x1xf32>, vector<2x1xf32> -> vector<2x1xf32>
    %c0_56 = arith.constant 0 : index
    %c0_57 = arith.constant 0 : index
    %71 = vector.load %arg8[%c0_56, %c0_57] : memref<1x1xf32, #tpu.memory_space<vmem>>, vector<1x1xf32>
    %72 = vector.broadcast %71 : vector<1x1xf32> to vector<2x1xf32>
    %73 = arith.addf %70, %72 : vector<2x1xf32>
    %c0_58 = arith.constant 0 : index
    %c0_59 = arith.constant 0 : index
    %74 = vector.load %arg9[%c0_58, %c0_59] : memref<2x1xf32, #tpu.memory_space<vmem>>, vector<2x1xf32>
    tpu.vector_store %arg9[%c0_58, %c0_59], %73 {strides = array<i32>} : memref<2x1xf32, #tpu.memory_space<vmem>>, vector<2x1xf32>,
    return
  }
}

</mosaic_0001>

<bundles_post_ra>
// kernel: tpu_custom_call.1
= control target key start
LH: loop header
LB: loop body
LE: loop exit
PB: predicated region body
PF: predicated region fallthrough
CT: control target
= control target key end

     0   :  { %s1405_s0 = inlined_call_operand.vmem [shape: s32[2], index: 0, kind: input, shape index: {}]   ;;  %s1406_s1 = inlined_call_operand.vmem [shape: f32[16,128], index: 1, kind: input, shape index: {}]   ;;  %s1407_s2 = inlined_call_operand.hbm [shape: bf16[16,16], index: 2, kind: input, shape index: {}]   ;;  %s1408_s3 = inlined_call_operand.hbm [shape: f32[3,128,256], index: 3, kind: input, shape index: {}]   ;;  %s1409_s4 = inlined_call_operand.vmem [shape: f32[3,1,128], index: 4, kind: input, shape index: {}]   ;;  %s1410_s5 = inlined_call_operand.vmem [shape: f32[128,128], index: 5, kind: input, shape index: {}]   ;;  %s1411_s6 = inlined_call_operand.vmem [shape: f32[1,128], index: 6, kind: input, shape index: {}]   ;;  %s1412_s7 = inlined_call_operand.vmem [shape: f32[128,1], index: 7, kind: input, shape index: {}]   ;;  %s1413_s9 = inlined_call_operand.vmem [shape: f32[2,1], index: 9, kind: output, shape index: {}]   ;;  %s1414_s8 = inlined_call_operand.<no memory space> [shape: f32[1,1], index: 8, kind: input, shape index: {}]  }
   0x1   :  { %s14_s11 = sshll.u32 %s1405_s0, 4  ;;  %v18_v0 = vstv %s1414_s8  ;;  %s15_s11 = int_to_ptr.vmem [resolvable:$true] %s14_s11 }
   0x2   :  { %19 = vst [vmem:[#allocation7] sm:$0x1] %v18_v0  ;;  %s1087_s14 = scalar_lea.vmem %s15_s11, 16  ;;  %p1092_p1 = scmp.lt.s32.totalorder %s15_s11, %s15_s11 }
   0x3   :  { %p1088_p0 = scmp.ne.s32.totalorder %s15_s11, %s1087_s14  ;;  %p1093_p2 = scmp.lt.s32.totalorder %s1087_s14, %s1087_s14 }
   0x5   :  { %p1094_p3 = por %p1093_p2, %p1092_p1 }
   0x7   :  { %p1095_p4 = pnand %p1094_p3, %p1088_p0 }
   0x9   :  { %1098 = shalt.err (!%p1095_p4)  }
   0xa   :  { %s1149_s15 = smov [#allocation6]  }
   0xb   :  { %17 = dma.vmem_to_smem %s15_s11, 16, %s1149_s15, [#allocation5] }
   0xc   :  { %1143 = dma.done.wait [#allocation5], 16 }
   0xd   :  { %1144 = vsyncadd [#allocation5], 4294967280 }
   0xe   :  { %21 = sfence }
   0xf   :  { %22 = vsyncpa [#allocation9], 0 }
  0x10   :  { %23 = vsyncpa [#allocation11], 0  ;;  %s1150_s0 = smov [#allocation8]   ;;  %s1099_s18 = scalar_lea.hbm %s1407_s2, 128 }
  0x11   :  { %s31_s16 = sshll.u32 %s1150_s0, 4  ;;  %p1100_p5 = scmp.ne.s32.totalorder %s1407_s2, %s1099_s18  ;;  %s32_s16 = int_to_ptr.vmem [resolvable:$true] %s31_s16 }
  0x12   :  { %p1103_p6 = scmp.lt.u32.totalorder %s1099_s18, %s1407_s2 }
  0x14   :  { %p1105_p7 = pnand %p1103_p6, %p1100_p5 }
  0x16   :  { %1108 = shalt.err (!%p1105_p7)
}
  0x17   :  { %s1109_s23 = scalar_lea.vmem %s32_s16, 128  ;;  %p1114_p9 = scmp.lt.s32.totalorder %s32_s16, %s32_s16 }
  0x18   :  { %p1110_p8 = scmp.ne.s32.totalorder %s32_s16, %s1109_s23  ;;  %p1115_p10 = scmp.lt.s32.totalorder %s1109_s23, %s1109_s23 }
  0x1a   :  { %p1116_p11 = por %p1115_p10, %p1114_p9 }
  0x1c   :  { %p1117_p12 = pnand %p1116_p11, %p1110_p8 }
  0x1e   :  { %1120 = shalt.err (!%p1117_p12)
}
  0x1f   :  { %s1151_s24 = smov 64   ;;  %s1152_s25 = smov 4  }
  0x20   :  { %37 = dma.hbm_to_vmem [thread:$0]  %s1407_s2, 128, %s32_s16, [#allocation9], %s1151_s24, %s1151_s24, %s1152_s25  }
  0x21   :  { %s1153_s28 = smov [#allocation10]   ;;  %s1121_s11 = scalar_lea.hbm %s1408_s3, 12288 }
  0x22   :  { %s43_s29 = sshll.u32 %s1153_s28, 4  ;;  %p1122_p13 = scmp.ne.s32.totalorder %s1408_s3, %s1121_s11  ;;  %s44_s29 = int_to_ptr.vmem [resolvable:$true] %s43_s29 }
  0x23   :  { %p1125_p0 = scmp.lt.u32.totalorder %s1121_s11, %s1408_s3 }
  0x25   :  { %p1127_p1 = pnand %p1125_p0, %p1122_p13 }
  0x27   :  { %1130 = shalt.err (!%p1127_p1)
}
  0x28   :  { %s1131_s0 = scalar_lea.vmem %s44_s29, 12288  ;;  %p1136_p3 = scmp.lt.s32.totalorder %s44_s29, %s44_s29 }
  0x29   :  { %p1132_p2 = scmp.ne.s32.totalorder %s44_s29, %s1131_s0  ;;  %p1137_p4 = scmp.lt.s32.totalorder %s1131_s0, %s1131_s0 }
  0x2b   :  { %p1138_p5 = por %p1137_p4, %p1136_p3 }
  0x2d   :  { %p1139_p6 = pnand %p1138_p5, %p1132_p2 }
  0x2f   :  { %1142 = shalt.err (!%p1139_p6)
}
  0x30   :  { %s1154_s2 = smov 256   ;;  %s1155_s16 = smov 16  }
  0x31   :  { %49 = dma.hbm_to_vmem [thread:$0]  %s1408_s3, 12288, %s44_s29, [#allocation11], %s1154_s2, %s1154_s2, %s1155_s16  }
  0x32   :  { %1145 = dma.done.wait [#allocation9], 128  }
  0x33   :  { %1146 = vsyncadd [#allocation9], 4294967168 }
  0x34   :  { %1147 = dma.done.wait [#allocation11], 12288  }
  0x35   :  { %1148 = vsyncadd [#allocation11], 4294955008  ;;  %v1156_v1 = vmov 0.0   ;;  %v72_v2 = vld [vmem:[#allocation10 + $0x8] sm:$0xff]  ;;  %v74_v3 = vld [vmem:[#allocation10 + $0x18] sm:$0xff]  ;;  %vm1157_vm0 = vmmov 0  }
  0x36   :  { %167 = vmatprep.mubr.f32.mxu0 %v1156_v1  ;;  %339 = vmatprep.mubr.f32.mxu1 %v1156_v1  ;;  %v71_v4 = vld [vmem:[#allocation10] sm:$0xff]  ;;  %v932_v5 = vpack.c.bf16 %v74_v3, %v72_v2  ;;  %v73_v6 = vld [vmem:[#allocation10 + $0x10] sm:$0xff]  ;;  %v76_v7 = vld [vmem:[#allocation10 + $0x28] sm:$0xff]  ;;  %vm193_vm1 = vcmask 130048   ;;  %s570_s12 = sld [smem:[#allocation6]]  ;;  %s800_s13 = sld [smem:[#allocation6 + $0x1]] }
  0x37   :  { %v78_v8 = vld [vmem:[#allocation10 + $0x38] sm:$0xff]  ;;  %v934_v9 = vpack.c.bf16 %v73_v6, %v71_v4  ;;  %v75_v11 = vld [vmem:[#allocation10 + $0x20] sm:$0xff]  ;;  %v77_v12 = vld [vmem:[#allocation10 + $0x30] sm:$0xff]  ;;  %vm776_vm2 = vcmask 1024  }
  0x38   :  { %v936_v10 = vpack.c.bf16 %v78_v8, %v76_v7  ;;  %v80_v13 = vld [vmem:[#allocation10 + $0x48] sm:$0xff]  ;;  %933 = vmatprep.subr.bf16.mxu0 %v932_v5  ;;  %v82_v14 = vld [vmem:[#allocation10 + $0x58] sm:$0xff]  ;;  %v938_v15 = vpack.c.bf16 %v77_v12, %v75_v11  ;;  %v79_v17 = vld [vmem:[#allocation10 + $0x40] sm:$0xff] }
  0x39   :  { %935 = vmatpush1.bf16.msra.mxu0 %v934_v9  ;;  %v940_v16 = vpack.c.bf16 %v82_v14, %v80_v13  ;;  %v81_v18 = vld [vmem:[#allocation10 + $0x50] sm:$0xff]  ;;  %v84_v19 = vld [vmem:[#allocation10 + $0x68] sm:$0xff]  ;;  %v86_v20 = vld [vmem:[#allocation10 + $0x78] sm:$0xff] }
  0x3a   :  { %937 = vmatprep.subr.bf16.mxu0 %v936_v10  ;;  %v942_v21 = vpack.c.bf16 %v81_v18, %v79_v17  ;;  %v944_v22 = vpack.c.bf16 %v86_v20, %v84_v19  ;;  %v83_v23 = vld [vmem:[#allocation10 + $0x60] sm:$0xff]  ;;  %v85_v24 = vld [vmem:[#allocation10 + $0x70] sm:$0xff]  ;;  %v88_v25 = vld [vmem:[#allocation10 + $0x88] sm:$0xff] }
  0x3b   :  { %v90_v26 = vld [vmem:[#allocation10 + $0x98] sm:$0xff]  ;;  %v946_v27 = vpack.c.bf16 %v85_v24, %v83_v23  ;;  %v87_v29 = vld [vmem:[#allocation10 + $0x80] sm:$0xff]  ;;  %v89_v30 = vld [vmem:[#allocation10 + $0x90] sm:$0xff] }
  0x3c   :  { %v948_v28 = vpack.c.bf16 %v90_v26, %v88_v25  ;;  %v92_v31 = vld [vmem:[#allocation10 + $0xa8] sm:$0xff]  ;;  %v94_v32 = vld [vmem:[#allocation10 + $0xb8] sm:$0xff]  ;;  %v950_v33 = vpack.c.bf16 %v89_v30, %v87_v29  ;;  %v91_v35 = vld [vmem:[#allocation10 + $0xa0] sm:$0xff]  ;;  %s571_s14 = scalar_lea.vmem [#allocation2], %s570_s12  ;;  %s579_s15 = scalar_lea.vmem [#allocation2], %s800_s13 }
  0x3d   :  { %939 = vmatpush1.bf16.msra.mxu0 %v938_v15  ;;  %v952_v34 = vpack.c.bf16 %v94_v32, %v92_v31  ;;  %v93_v36 = vld [vmem:[#allocation10 + $0xb0] sm:$0xff]  ;;  %v96_v37 = vld [vmem:[#allocation10 + $0xc8] sm:$0xff]  ;;  %v98_v38 = vld [vmem:[#allocation10 + $0xd8] sm:$0xff] }
  0x3e   :  { %941 = vmatprep.subr.bf16.mxu0 %v940_v16  ;;  %v954_v39 = vpack.c.bf16 %v93_v36, %v91_v35  ;;  %v956_v40 = vpack.c.bf16 %v98_v38, %v96_v37  ;;  %v95_v41 = vld [vmem:[#allocation10 + $0xc0] sm:$0xff]  ;;  %v97_v42 = vld [vmem:[#allocation10 + $0xd0] sm:$0xff]  ;;  %v100_v43 = vld [vmem:[#allocation10 + $0xe8] sm:$0xff] }
  0x3f   :  { %v102_v44 = vld [vmem:[#allocation10 + $0xf8] sm:$0xff]  ;;  %v958_v45 = vpack.c.bf16 %v97_v42, %v95_v41  ;;  %v99_v47 = vld [vmem:[#allocation10 + $0xe0] sm:$0xff]  ;;  %v101_v48 = vld [vmem:[#allocation10 + $0xf0] sm:$0xff] }
  0x40   :  { %v960_v46 = vpack.c.bf16 %v102_v44, %v100_v43  ;;  %v962_v49 = vpack.c.bf16 %v101_v48, %v99_v47  ;;  %v69_v50 = vld [vmem:[%s1406_s1] sm:$0xff]  ;;  %v70_v51 = vld [vmem:[%s1406_s1 + $0x8] sm:$0xff]  ;;  %v246_v53 = vld [vmem:[#allocation10 + $0x118] sm:$0xff] }
  0x41   :  { %943 = vmatpush1.bf16.msra.mxu0 %v942_v21  ;;  %v244_v52 = vld [vmem:[#allocation10 + $0x108] sm:$0xff]  ;;  %v243_v54 = vld [vmem:[#allocation10 + $0x100] sm:$0xff]  ;;  %v245_v56 = vld [vmem:[#allocation10 + $0x110] sm:$0xff] }
  0x42   :  { %945 = vmatprep.subr.bf16.mxu0 %v944_v22  ;;  %v964_v55 = vpack.c.bf16 %v246_v53, %v244_v52  ;;  %v248_v57 = vld [vmem:[#allocation10 + $0x128] sm:$0xff]  ;;  %v250_v58 = vld [vmem:[#allocation10 + $0x138] sm:$0xff]  ;;  %v966_v59 = vpack.c.bf16 %v245_v56, %v243_v54  ;;  %v247_v61 = vld [vmem:[#allocation10 + $0x120] sm:$0xff] }
  0x43   :  { %v968_v60 = vpack.c.bf16 %v250_v58, %v248_v57  ;;  %v249_v62 = vld [vmem:[#allocation10 + $0x130] sm:$0xff]  ;;  %v252_v63 = vld [vmem:[#allocation10 + $0x148] sm:$0xff]  ;;  %v254_v0 = vld [vmem:[#allocation10 + $0x158] sm:$0xff] }
  0x44   :  { %965 = vmatprep.subr.bf16.mxu1 %v964_v55  ;;  %v970_v2 = vpack.c.bf16 %v249_v62, %v247_v61  ;;  %v972_v3 = vpack.c.bf16 %v254_v0, %v252_v63  ;;  %v251_v4 = vld [vmem:[#allocation10 + $0x140] sm:$0xff]  ;;  %v253_v5 = vld [vmem:[#allocation10 + $0x150] sm:$0xff]  ;;  %v256_v6 = vld [vmem:[#allocation10 + $0x168] sm:$0xff] }
  0x45   :  { %947 = vmatpush1.bf16.msra.mxu0 %v946_v27  ;;  %967 = vmatpush1.bf16.msra.mxu1 %v966_v59  ;;  %v258_v7 = vld [vmem:[#allocation10 + $0x178] sm:$0xff]  ;;  %v974_v8 = vpack.c.bf16 %v253_v5, %v251_v4  ;;  %v255_v10 = vld [vmem:[#allocation10 + $0x160] sm:$0xff]  ;;  %v257_v11 = vld [vmem:[#allocation10 + $0x170] sm:$0xff] }
  0x46   :  { %949 = vmatprep.subr.bf16.mxu0 %v948_v28  ;;  %969 = vmatprep.subr.bf16.mxu1 %v968_v60  ;;  %v976_v9 = vpack.c.bf16 %v258_v7, %v256_v6  ;;  %v260_v12 = vld [vmem:[#allocation10 + $0x188] sm:$0xff]  ;;  %v262_v13 = vld [vmem:[#allocation10 + $0x198] sm:$0xff]  ;;  %v978_v14 = vpack.c.bf16 %v257_v11, %v255_v10  ;;  %v259_v16 = vld [vmem:[#allocation10 + $0x180] sm:$0xff] }
  0x47   :  { %v980_v15 = vpack.c.bf16 %v262_v13, %v260_v12  ;;  %v261_v17 = vld [vmem:[#allocation10 + $0x190] sm:$0xff]  ;;  %v264_v18 = vld [vmem:[#allocation10 + $0x1a8] sm:$0xff]  ;;  %v266_v19 = vld [vmem:[#allocation10 + $0x1b8] sm:$0xff] }
  0x48   :  { %v982_v20 = vpack.c.bf16 %v261_v17, %v259_v16  ;;  %v984_v21 = vpack.c.bf16 %v266_v19, %v264_v18  ;;  %v263_v22 = vld [vmem:[#allocation10 + $0x1a0] sm:$0xff]  ;;  %v265_v23 = vld [vmem:[#allocation10 + $0x1b0] sm:$0xff]  ;;  %v268_v24 = vld [vmem:[#allocation10 + $0x1c8] sm:$0xff] }
  0x49   :  { %951 = vmatpush1.bf16.msra.mxu0 %v950_v33  ;;  %971 = vmatpush1.bf16.msra.mxu1 %v970_v2  ;;  %v270_v25 = vld [vmem:[#allocation10 + $0x1d8] sm:$0xff]  ;;  %v986_v26 = vpack.c.bf16 %v265_v23, %v263_v22  ;;  %v269_v35 = vld [vmem:[#allocation10 + $0x1d0] sm:$0xff]  ;;  %v272_v37 = vld [vmem:[#allocation10 + $0x1e8] sm:$0xff] }
  0x4a   :  { %953 = vmatprep.subr.bf16.mxu0 %v952_v34  ;;  %973 = vmatprep.subr.bf16.mxu1 %v972_v3  ;;  %v988_v27 = vpack.c.bf16 %v270_v25, %v268_v24  ;;  %v1251_v33 = vld [vmem:[#allocation8] sm:$0xff]   ;;  %v267_v34 = vld [vmem:[#allocation10 + $0x1c0] sm:$0xff]  ;;  %v273_v41 = vld [vmem:[#allocation10 + $0x1f0] sm:$0xff] }
  0x4b   :  { %v990_v36 = vpack.c.bf16 %v269_v35, %v267_v34  ;;  %v274_v38 = vld [vmem:[#allocation10 + $0x1f8] sm:$0xff]  ;;  %v790_v43 = vld [vmem:[%s1409_s4] ss:$0 sm:$0xff]  ;;  %v408_v54 = vld [vmem:[#allocation10 + $0x208] sm:$0xff] }
  0x4c   :  { %v410_v55 = vld [vmem:[#allocation10 + $0x218] sm:$0xff]  ;;  %v407_v56 = vld [vmem:[#allocation10 + $0x200] sm:$0xff]  ;;  %v409_v58 = vld [vmem:[#allocation10 + $0x210] sm:$0xff] }
  0x4d   :  { %955 = vmatpush1.bf16.msra.mxu0 %v954_v39  ;;  %975 = vmatpush1.bf16.msra.mxu1 %v974_v8  ;;  %v992_v39 = vpack.c.bf16 %v274_v38, %v272_v37  ;;  %v996_v57 = vpack.c.bf16 %v410_v55, %v408_v54  ;;  %v412_v59 = vld [vmem:[#allocation10 + $0x228] sm:$0xff]  ;;  %v414_v60 = vld [vmem:[#allocation10 + $0x238] sm:$0xff]  ;;  %v998_v61 = vpack.c.bf16 %v409_v58, %v407_v56  ;;  %v411_v63 = vld [vmem:[#allocation10 + $0x220] sm:$0xff]  ;;  %v1158_v56 = vmov 0.0|0.0  }
  0x4e   :  { %957 = vmatprep.subr.bf16.mxu0 %v956_v40  ;;  %977 = vmatprep.subr.bf16.mxu1 %v976_v9  ;;  %v271_v40 = vld [vmem:[#allocation10 + $0x1e0] sm:$0xff]  ;;  %v1000_v62 = vpack.c.bf16 %v414_v60, %v412_v59  ;;  %v413_v0 = vld [vmem:[#allocation10 + $0x230] sm:$0xff]  ;;  %v416_v2 = vld [vmem:[#allocation10 + $0x248] sm:$0xff] }
  0x4f   :  { %v994_v42 = vpack.c.bf16 %v273_v41, %v271_v40  ;;  %v418_v3 = vld [vmem:[#allocation10 + $0x258] sm:$0xff]  ;;  %v1002_v4 = vpack.c.bf16 %v413_v0, %v411_v63  ;;  %v415_v6 = vld [vmem:[#allocation10 + $0x240] sm:$0xff]  ;;  %v417_v7 = vld [vmem:[#allocation10 + $0x250] sm:$0xff] }
  0x50   :  { %v1004_v5 = vpack.c.bf16 %v418_v3, %v416_v2  ;;  %v420_v8 = vld [vmem:[#allocation10 + $0x268] sm:$0xff]  ;;  %v422_v9 = vld [vmem:[#allocation10 + $0x278] sm:$0xff]  ;;  %v1006_v10 = vpack.c.bf16 %v417_v7, %v415_v6  ;;  %v419_v12 = vld [vmem:[#allocation10 + $0x260] sm:$0xff] }
  0x51   :  { %959 = vmatpush1.bf16.msra.mxu0 %v958_v45  ;;  %979 = vmatpush1.bf16.msra.mxu1 %v978_v14  ;;  %v1008_v11 = vpack.c.bf16 %v422_v9, %v420_v8  ;;  %v421_v13 = vld [vmem:[#allocation10 + $0x270] sm:$0xff]  ;;  %v424_v14 = vld [vmem:[#allocation10 + $0x288] sm:$0xff]  ;;  %v423_v18 = vld [vmem:[#allocation10 + $0x280] sm:$0xff] }
  0x52   :  { %961 = vmatprep.subr.bf16.mxu0 %v960_v46  ;;  %981 = vmatprep.subr.bf16.mxu1 %v980_v15  ;;  %v426_v15 = vld [vmem:[#allocation10 + $0x298] sm:$0xff]  ;;  %v1010_v16 = vpack.c.bf16 %v421_v13, %v419_v12  ;;  %v425_v19 = vld [vmem:[#allocation10 + $0x290] sm:$0xff]  ;;  %v427_v24 = vld [vmem:[#allocation10 + $0x2a0] sm:$0xff] }
  0x53   :  { %v1012_v17 = vpack.c.bf16 %v426_v15, %v424_v14  ;;  %v1014_v22 = vpack.c.bf16 %v425_v19, %v423_v18  ;;  %v429_v25 = vld [vmem:[#allocation10 + $0x2b0] sm:$0xff]  ;;  %v438_v40 = vld [vmem:[#allocation10 + $0x2f8] sm:$0xff]  ;;  %v589_v60 = vld [vmem:[%s1410_s5] sm:$0xff] }
  0x54   :  { %v433_v37 = vld [vmem:[#allocation10 + $0x2d0] sm:$0xff]  ;;  %v592_v3 = vld [vmem:[%s1410_s5 + $0x18] sm:$0xff]  ;;  %v597_v9 = vld [vmem:[%s1410_s5 + $0x40] sm:$0xff] }
  0x55   :  { %963 = vmatpush1.bf16.msra.mxu0 %v962_v49  ;;  %983 = vmatpush1.bf16.msra.mxu1 %v982_v20  ;;  %v428_v20 = vld [vmem:[#allocation10 + $0x2a8] sm:$0xff]  ;;  %v591_v2 = vld [vmem:[%s1410_s5 + $0x10] sm:$0xff]  ;;  %v600_v13 = vld [vmem:[%s1410_s5 + $0x58] sm:$0xff] }
  0x56   :  { %844 = vmatprep.subr.bf16.mxu0 %v1156_v1  ;;  %985 = vmatprep.subr.bf16.mxu1 %v984_v21  ;;  %v430_v21 = vld [vmem:[#allocation10 + $0x2b8] sm:$0xff]  ;;  %v594_v6 = vld [vmem:[%s1410_s5 + $0x28] sm:$0xff]  ;;  %v601_v15 = vld [vmem:[%s1410_s5 + $0x60] sm:$0xff] }
  0x57   :  { %v1016_v23 = vpack.c.bf16 %v430_v21, %v428_v20  ;;  %v599_v12 = vld [vmem:[%s1410_s5 + $0x50] sm:$0xff]  ;;  %v604_v19 = vld [vmem:[%s1410_s5 + $0x78] sm:$0xff]  ;;  %v683_v21 = vld [vmem:[%s1412_s7] sm:$0xff] }
  0x58   :  { %168 = vmatmul.mubr.f32.vlgmr.msra.gmra.mrb[0].mxu0 %v69_v50  ;;  %v1044_v14 = vpack.c.bf16 %v600_v13, %v599_v12 }
  0x59   :  { %173 = vmatprep.mubr.f32.mxu0 %v1156_v1  ;;  %987 = vmatpush1.bf16.msra.mxu1 %v986_v26  ;;  %v432_v26 = vld [vmem:[#allocation10 + $0x2c8] sm:$0xff] }
  0x5a   :  { %989 = vmatprep.subr.bf16.mxu1 %v988_v27  ;;  %v434_v27 = vld [vmem:[#allocation10 + $0x2d8] sm:$0xff] }
  0x5c   :  { %174 = vmatmul.mubr.f32.gmra.mrb[2].mxu0 %v70_v51 }
  0x5d   :  { %846 = vmatprep.mubr.msk.bf16.mxu0 %vm1157_vm0, %v1156_v1  ;;  %991 = vmatpush1.bf16.msra.mxu1 %v990_v36  ;;  %v431_v36 = vld [vmem:[#allocation10 + $0x2c0] sm:$0xff] }
  0x5e   :  { %993 = vmatprep.subr.bf16.mxu1 %v992_v39  ;;  %v1022_v38 = vpack.c.bf16 %v433_v37, %v431_v36  ;;  %v436_v39 = vld [vmem:[#allocation10 + $0x2e8] sm:$0xff]  ;;  %v693_v37 = vld [vmem:[%s1412_s7 + $0x50] sm:$0xff] }
  0x5f   :  { %v1024_v41 = vpack.c.bf16 %v438_v40, %v436_v39  ;;  %v695_v40 = vld [vmem:[%s1412_s7 + $0x60] sm:$0xff] }
  0x61   :  { %995 = vmatpush1.bf16.msra.mxu1 %v994_v42  ;;  %v435_v42 = vld [vmem:[#allocation10 + $0x2e0] sm:$0xff] }
  0x62   :  { %997 = vmatprep.subr.bf16.mxu1 %v996_v57 }
 0x12b   :  { %v169_v28 = vpop.f32.mrb[0].mxu0 }
 0x12c   :  { %v171_v29 = vpop.f32.mrb[1].mxu0 }
 0x12f   :  { %v175_v30 = vpop.f32.mrb[2].mxu0 }
 0x130   :  { %v180_v31 = vpack.c.bf16 %v175_v30, %v169_v28  ;;  %v177_v32 = vpop.f32.mrb[3].mxu0  ;;  %v1018_v28 = vpack.c.bf16 %v429_v25, %v427_v24  ;;  %v686_v25 = vld [vmem:[%s1412_s7 + $0x18] sm:$0xff] }
 0x132   :  { %845 = vmatpush3.bf16.msra.mxu0 %v180_v31 }
 0x133   :  { %850 = vmatprep.subr.bf16.mxu0 %v1156_v1 }
 0x135   :  { %847 = vmatmul.mubr.msk.bf16.vlgmr.msra.gmra.mrb[4].mxu0 %vm193_vm1, %v1251_v33 }
 0x136   :  { %852 = vmatprep.mubr.msk.bf16.mxu0 %vm1157_vm0, %v1156_v1 }
 0x208   :  { %v231_v44 = vpop.f32.mrb[4].mxu0 }
 0x209   :  { %v232_v45 = vadd.f32 %v790_v43, %v231_v44  ;;  %v848_v46 = vpop.f32.mrb[5].mxu0 }
 0x20a   :  { %v234_v47 = vpop.f32.mrb[6].mxu0 }
 0x20b   :  { %v238_v48 = vadd.f32 %v232_v45, %v171_v29  ;;  %v235_v49 = vadd.f32 %v790_v43, %v234_v47  ;;  %v849_v50 = vpop.f32.mrb[7].mxu0  ;;  %v1020_v29 = vpack.c.bf16 %v434_v27, %v432_v26  ;;  %v437_v43 = vld [vmem:[#allocation10 + $0x2f0] sm:$0xff]  ;;  %v794_v45 = vld [vmem:[%s1409_s4 + $0x1] ss:$0 sm:$0xff] }
 0x20c   :  { %v1026_v44 = vpack.c.bf16 %v437_v43, %v435_v42  ;;  %v687_v27 = vld [vmem:[%s1412_s7 + $0x20] sm:$0xff] }
 0x20d   :  { %v240_v51 = vmax.f32 %v238_v48, 0.0  ;;  %v239_v52 = vadd.f32 %v235_v49, %v177_v32  ;;  %v797_v43 = vld [vmem:[%s1409_s4 + $0x2] ss:$0 sm:$0xff] }
 0x20f   :  { %340 = vmatmul.mubr.f32.vlgmr.msra.gmra.mrb[0].mxu1 %v240_v51  ;;  %v241_v53 = vmax.f32 %v239_v52, 0.0 }
 0x210   :  { %345 = vmatprep.mubr.f32.mxu1 %v1156_v1  ;;  %999 = vmatpush1.bf16.msra.mxu1 %v998_v61  ;;  %v590_v61 = vld [vmem:[%s1410_s5 + $0x8] sm:$0xff] }
 0x211   :  { %1001 = vmatprep.subr.bf16.mxu1 %v1000_v62  ;;  %v1029_v0 = vpack.c.bf16 %v590_v61, %v589_v60  ;;  %v698_v60 = vld [vmem:[%s1412_s7 + $0x78] sm:$0xff] }
 0x213   :  { %346 = vmatmul.mubr.f32.gmra.mrb[2].mxu1 %v241_v53 }
 0x214   :  { %503 = vmatprep.mubr.f32.mxu1 %v1156_v1  ;;  %1003 = vmatpush1.bf16.msra.mxu1 %v1002_v4  ;;  %v1032_v4 = vpack.c.bf16 %v592_v3, %v591_v2 }
 0x215   :  { %1005 = vmatprep.subr.bf16.mxu1 %v1004_v5  ;;  %v593_v5 = vld [vmem:[%s1410_s5 + $0x20] sm:$0xff] }
 0x216   :  { %v1035_v7 = vpack.c.bf16 %v594_v6, %v593_v5 }
 0x218   :  { %1007 = vmatpush1.bf16.msra.mxu1 %v1006_v10  ;;  %v598_v10 = vld [vmem:[%s1410_s5 + $0x48] sm:$0xff] }
 0x219   :  { %1009 = vmatprep.subr.bf16.mxu1 %v1008_v11  ;;  %v1041_v11 = vpack.c.bf16 %v598_v10, %v597_v9 }
 0x21c   :  { %1011 = vmatpush1.bf16.msra.mxu1 %v1010_v16  ;;  %v602_v16 = vld [vmem:[%s1410_s5 + $0x68] sm:$0xff] }
 0x21d   :  { %1013 = vmatprep.subr.bf16.mxu1 %v1012_v17  ;;  %v603_v17 = vld [vmem:[%s1410_s5 + $0x70] sm:$0xff]  ;;  %v1047_v18 = vpack.c.bf16 %v602_v16, %v601_v15 }
 0x21e   :  { %v1050_v20 = vpack.c.bf16 %v604_v19, %v603_v17 }
 0x220   :  { %1015 = vmatpush1.bf16.msra.mxu1 %v1014_v22  ;;  %v684_v22 = vld [vmem:[%s1412_s7 + $0x8] sm:$0xff] }
 0x221   :  { %1017 = vmatprep.subr.bf16.mxu1 %v1016_v23  ;;  %v685_v23 = vld [vmem:[%s1412_s7 + $0x10] sm:$0xff]  ;;  %v1053_v24 = vpack.c.bf16 %v684_v22, %v683_v21 }
 0x222   :  { %v1056_v26 = vpack.c.bf16 %v686_v25, %v685_v23 }
 0x224   :  { %1019 = vmatpush1.bf16.msra.mxu1 %v1018_v28  ;;  %v688_v28 = vld [vmem:[%s1412_s7 + $0x28] sm:$0xff] }
 0x225   :  { %1021 = vmatprep.subr.bf16.mxu1 %v1020_v29  ;;  %v1059_v29 = vpack.c.bf16 %v688_v28, %v687_v27 }
 0x228   :  { %1023 = vmatpush1.bf16.msra.mxu1 %v1022_v38  ;;  %v694_v38 = vld [vmem:[%s1412_s7 + $0x58] sm:$0xff] }
 0x229   :  { %1025 = vmatprep.subr.bf16.mxu1 %v1024_v41  ;;  %v1068_v39 = vpack.c.bf16 %v694_v38, %v693_v37  ;;  %v696_v41 = vld [vmem:[%s1412_s7 + $0x68] sm:$0xff] }
 0x22a   :  { %v1071_v42 = vpack.c.bf16 %v696_v41, %v695_v40 }
 0x22c   :  { %1027 = vmatpush1.bf16.msra.mxu1 %v1026_v44 }
 0x22d   :  { %1052 = vmatprep.subr.bf16.mxu1 %v1158_v56 }
 0x2e2   :  { %v341_v30 = vpop.f32.mrb[0].mxu1 }
 0x2e3   :  { %v343_v31 = vpop.f32.mrb[1].mxu1 }
 0x2e6   :  { %v347_v32 = vpop.f32.mrb[2].mxu1 }
 0x2e7   :  { %v352_v34 = vpack.c.bf16 %v347_v32, %v341_v30  ;;  %v349_v35 = vpop.f32.mrb[3].mxu1  ;;  %v689_v30 = vld [vmem:[%s1412_s7 + $0x30] sm:$0xff] }
 0x2e9   :  { %851 = vmatpush3.bf16.msra.mxu0 %v352_v34  ;;  %v691_v34 = vld [vmem:[%s1412_s7 + $0x40] sm:$0xff] }
 0x2ea   :  { %856 = vmatprep.subr.bf16.mxu0 %v1156_v1 }
 0x2ec   :  { %853 = vmatmul.mubr.msk.bf16.vlgmr.msra.gmra.mrb[8].mxu0 %vm193_vm1, %v1251_v33 }
 0x2ed   :  { %858 = vmatprep.mubr.msk.bf16.mxu0 %vm1157_vm0, %v1156_v1 }
 0x3bf   :  { %v395_v46 = vpop.f32.mrb[8].mxu0 }
 0x3c0   :  { %v396_v47 = vadd.f32 %v794_v45, %v395_v46  ;;  %v854_v48 = vpop.f32.mrb[9].mxu0 }
 0x3c1   :  { %v398_v49 = vpop.f32.mrb[10].mxu0 }
 0x3c2   :  { %v402_v50 = vadd.f32 %v396_v47, %v343_v31  ;;  %v399_v51 = vadd.f32 %v794_v45, %v398_v49  ;;  %v855_v52 = vpop.f32.mrb[11].mxu0  ;;  %v690_v31 = vld [vmem:[%s1412_s7 + $0x38] sm:$0xff] }
 0x3c3   :  { %v1062_v32 = vpack.c.bf16 %v690_v31, %v689_v30 }
 0x3c4   :  { %v404_v53 = vmax.f32 %v402_v50, 0.0  ;;  %v403_v54 = vadd.f32 %v399_v51, %v349_v35  ;;  %v692_v35 = vld [vmem:[%s1412_s7 + $0x48] sm:$0xff] }
 0x3c5   :  { %v1065_v36 = vpack.c.bf16 %v692_v35, %v691_v34 }
 0x3c6   :  { %504 = vmatmul.mubr.f32.vlgmr.msra.gmra.mrb[4].mxu1 %v404_v53  ;;  %v405_v55 = vmax.f32 %v403_v54, 0.0 }
 0x3c7   :  { %509 = vmatprep.mubr.f32.mxu1 %v1156_v1  ;;  %1054 = vmatpush3.bf16.msra.mxu1 %v1053_v24 }
 0x3c8   :  { %1055 = vmatprep.subr.bf16.mxu1 %v1158_v56 }
 0x3ca   :  { %510 = vmatmul.mubr.f32.gmra.mrb[6].mxu1 %v405_v55 }
 0x3cb   :  { %929 = vmatprep.mubr.msk.f32.mxu1 %vm1157_vm0, %v1156_v1  ;;  %1057 = vmatpush3.bf16.msra.mxu1 %v1056_v26 }
 0x3cc   :  { %1058 = vmatprep.subr.bf16.mxu1 %v1158_v56 }
 0x3cf   :  { %1060 = vmatpush3.bf16.msra.mxu1 %v1059_v29 }
 0x3d0   :  { %1061 = vmatprep.subr.bf16.mxu1 %v1158_v56 }
 0x3d3   :  { %1063 = vmatpush3.bf16.msra.mxu1 %v1062_v32 }
 0x3d4   :  { %1064 = vmatprep.subr.bf16.mxu1 %v1158_v56 }
 0x3d7   :  { %1066 = vmatpush3.bf16.msra.mxu1 %v1065_v36 }
 0x3d8   :  { %1067 = vmatprep.subr.bf16.mxu1 %v1158_v56 }
 0x3db   :  { %1069 = vmatpush3.bf16.msra.mxu1 %v1068_v39 }
 0x3dc   :  { %1070 = vmatprep.subr.bf16.mxu1 %v1158_v56 }
 0x3df   :  { %1072 = vmatpush3.bf16.msra.mxu1 %v1071_v42 }
 0x3e0   :  { %1073 = vmatprep.subr.bf16.mxu1 %v1158_v56 }
 0x499   :  { %v505_v57 = vpop.f32.mrb[4].mxu1 }
 0x49a   :  { %v1275_v58 = vpop.f32.mrb[5].mxu1 }
 0x49d   :  { %v511_v59 = vpop.f32.mrb[6].mxu1 }
 0x49e   :  { %v516_v62 = vpack.c.bf16 %v511_v59, %v505_v57  ;;  %v1283_v63 = vpop.f32.mrb[7].mxu1  ;;  %v697_v59 = vld [vmem:[%s1412_s7 + $0x70] sm:$0xff] }
 0x49f   :  { %v1074_v61 = vpack.c.bf16 %v698_v60, %v697_v59 }
 0x4a0   :  { %857 = vmatpush3.bf16.msra.mxu0 %v516_v62  ;;  %v802_v62 = vld [vmem:[%s1411_s6] ss:$0 sm:$0xff] }
 0x4a1   :  { %1028 = vmatprep.subr.bf16.mxu0 %v1158_v56  ;;  %1075 = vmatpush3.bf16.msra.mxu1 %v1074_v61 }
 0x4a3   :  { %859 = vmatmul.mubr.msk.bf16.vlgmr.msra.gmra.mrb[12].mxu0 %vm193_vm1, %v1251_v33  ;;  %v596_v33 = vld [vmem:[%s1410_s5 + $0x38] sm:$0xff] }
 0x4a4   :  { %1030 = vmatpush3.bf16.msra.mxu0 %v1029_v0  ;;  %894 = vmatprep.mubr.msk.f32.mxu0 %vm1157_vm0, %v1156_v1  ;;  %v595_v1 = vld [vmem:[%s1410_s5 + $0x30] sm:$0xff] }
 0x4a5   :  { %1031 = vmatprep.subr.bf16.mxu0 %v1158_v56  ;;  %v1038_v8 = vpack.c.bf16 %v596_v33, %v595_v1 }
 0x4a8   :  { %1033 = vmatpush3.bf16.msra.mxu0 %v1032_v4  ;;  %v803_v4 = vld [vmem:[#allocation7] ss:$0 sm:$0xff] }
 0x4a9   :  { %1034 = vmatprep.subr.bf16.mxu0 %v1158_v56 }
 0x4ac   :  { %1036 = vmatpush3.bf16.msra.mxu0 %v1035_v7 }
 0x4ad   :  { %1037 = vmatprep.subr.bf16.mxu0 %v1158_v56 }
 0x4b0   :  { %1039 = vmatpush3.bf16.msra.mxu0 %v1038_v8 }
 0x4b1   :  { %1040 = vmatprep.subr.bf16.mxu0 %v1158_v56 }
 0x4b4   :  { %1042 = vmatpush3.bf16.msra.mxu0 %v1041_v11 }
 0x4b5   :  { %1043 = vmatprep.subr.bf16.mxu0 %v1158_v56 }
 0x4b8   :  { %1045 = vmatpush3.bf16.msra.mxu0 %v1044_v14 }
 0x4b9   :  { %1046 = vmatprep.subr.bf16.mxu0 %v1158_v56 }
 0x4bc   :  { %1048 = vmatpush3.bf16.msra.mxu0 %v1047_v18 }
 0x4bd   :  { %1049 = vmatprep.subr.bf16.mxu0 %v1158_v56 }
 0x4c0   :  { %1051 = vmatpush3.bf16.msra.mxu0 %v1050_v20 }
 0x576   :  { %v559_v44 = vpop.f32.mrb[12].mxu0 }
 0x577   :  { %v560_v45 = vadd.f32 %v797_v43, %v559_v44  ;;  %v860_v46 = vpop.f32.mrb[13].mxu0 }
 0x578   :  { %v562_v47 = vpop.f32.mrb[14].mxu0 }
 0x579   :  { %v566_v48 = vadd.f32 %v560_v45, %v1275_v58  ;;  %v563_v49 = vadd.f32 %v797_v43, %v562_v47  ;;  %v861_v50 = vpop.f32.mrb[15].mxu0 }
 0x57b   :  { %568 = vst [vmem:[#allocation2] sm:$0xff] %v566_v48  ;;  %v567_v51 = vadd.f32 %v563_v49, %v1283_v63 }
 0x57d   :  { %569 = vst [vmem:[#allocation2 + $0x8] sm:$0xff] %v567_v51 }
 0x584   :  { %v572_v52 = vld [vmem:[%s571_s14] sm:$0x1]  ;;  %v799_v53 = vld [vmem:[%s571_s14 + $0x1] sm:$0x1] }
 0x585   :  { %v580_v54 = vld [vmem:[%s579_s15] sm:$0x1]  ;;  %573 = vst [vmem:[#allocation3] sm:$0x1] %v572_v52  ;;  %577 = vst [vmem:[#allocation4] sm:$0x1] %v799_v53 }
 0x586   :  { %581 = vst [vmem:[#allocation3 + $0x1] sm:$0x1] %v580_v54  ;;  %v801_v55 = vld [vmem:[%s579_s15 + $0x1] sm:$0x1] }
 0x587   :  { %585 = vst [vmem:[#allocation4 + $0x1] sm:$0x1] %v801_v55 }
 0x58d   :  { %v586_v56 = vld [vmem:[#allocation3] sm:$0x3] }
 0x58e   :  { %v587_v57 = vld [vmem:[#allocation4] sm:$0x3] }
 0x58f   :  { %v588_v58 = vmul.f32 %v587_v57, %v586_v56 }
 0x591   :  { %895 = vmatmul.mubr.f32.vlgmr.msra.gmra.mrb[16].mxu0 %v588_v58 }
 0x664   :  { %v678_v63 = vpop.f32.mrb[16].mxu0 }
 0x665   :  { %v679_v0 = vadd.f32 %v802_v62, %v678_v63  ;;  %v896_v2 = vpop.f32.mrb[17].mxu0 }
 0x667   :  { %v682_v3 = vmax.f32 %v679_v0, 0.0 }
 0x669   :  { %930 = vmatmul.mubr.f32.vlgmr.msra.gmra.mrb[8].mxu1 %v682_v3 }
 0x73c   :  { %v772_v5 = vpop.f32.mrb[8].mxu1 }
 0x73d   :  { %v773_v6 = vadd.f32 %v803_v4, %v772_v5  ;;  %v931_v7 = vpop.f32.mrb[9].mxu1 }
 0x73f   :  { %777 = vst.msk [vmem:[%s1413_s9] sm:$0x3] %vm776_vm2, %v773_v6 }
 0x740   :  { %782 = vsyncpa [#allocation9], 1 }
 0x741   :  { %783 = vsyncpa [#allocation11], 1 }

</bundles_post_ra>
